<compile_context>
chip_gen: v7x
topology: tpu7x:2x2x1
jax: 0.10.0
libtpu: 0.0.40
codegen_flags: <defaults>
</compile_context>

<pallas_src>
import functools

import jax
import jax.numpy as jnp
from jax.experimental import pallas as pl
from jax.experimental.pallas import tpu as pltpu

EPS = 1e-5
K = 9        # depthwise kernel size
PAD = 4      # depthwise padding


def _shift_lanes(y, d, zpad):
    """Return z with z[..., l] = y[..., l + d], zero where l + d is out of range."""
    if d == 0:
        return y
    if d > 0:
        return jnp.concatenate([y[:, :, d:], zpad[:, :, :d]], axis=2)
    return jnp.concatenate([zpad[:, :, :-d], y[:, :, :d]], axis=2)


def _branch4_kernel(x_ref, w1_ref, w2_ref, g1_ref, b1_ref, g2_ref, b2_ref,
                    out_ref, *scratch, N, Cin, Cout, L, L_out, stride):
    # ---- pointwise conv (kernel_size=1): Cin broadcast-FMAs on the VPU ----
    x = x_ref[...]                       # (N, Cin, L)   L on lanes
    w1 = w1_ref[...]                     # (Cout, Cin)
    y = x[:, 0:1, :] * w1[:, 0:1].reshape(1, Cout, 1)
    for ci in range(1, Cin):             # static unroll (Cin is small)
        y = y + x[:, ci:ci + 1, :] * w1[:, ci:ci + 1].reshape(1, Cout, 1)

    # ---- BatchNorm1d #1 (training-mode batch stats over N, L) + ReLU ----
    inv_n1 = 1.0 / float(N * L)
    s1 = jnp.sum(y, axis=(0, 2), keepdims=True)            # (1, Cout, 1)
    q1 = jnp.sum(y * y, axis=(0, 2), keepdims=True)
    m1 = s1 * inv_n1
    v1 = jnp.maximum(q1 * inv_n1 - m1 * m1, 0.0)            # biased variance
    y = (y - m1) * (jax.lax.rsqrt(v1 + EPS) * g1_ref[...]) + b1_ref[...]
    y = jnp.maximum(y, 0.0)

    # ---- depthwise conv (groups=Cout, k=9, pad=4): lane-shift taps ----
    w2 = w2_ref[...]                     # (Cout, K)
    taps = [w2[:, k:k + 1].reshape(1, Cout, 1) for k in range(K)]  # hoisted
    zpad = jnp.zeros((N, Cout, PAD), jnp.float32)

    acc0 = y * taps[PAD]                 # center tap (offset d = 0)
    acc1 = jnp.zeros_like(y)
    for k in range(K):                   # static unroll, 2 independent chains
        d = k - PAD
        if d == 0:
            continue
        sh = _shift_lanes(y, d, zpad)
        if k % 2 == 0:
            acc0 = acc0 + sh * taps[k]
        else:
            acc1 = acc1 + sh * taps[k]
    full = acc0 + acc1                   # (N, Cout, L): stride-1 "same" conv

    if stride == 1:
        conv = full                      # L_out == L
    else:
        # TODO(synk): strided lane read path is not exercised by the test.
        s_ref = scratch[0]
        s_ref[...] = full
        conv = s_ref[:, :, pl.ds(0, L_out, stride=stride)]

    # ---- BatchNorm1d #2 (training-mode batch stats over N, L_out) + ReLU ----
    inv_n2 = 1.0 / float(N * L_out)
    s2 = jnp.sum(conv, axis=(0, 2), keepdims=True)
    q2 = jnp.sum(conv * conv, axis=(0, 2), keepdims=True)
    m2 = s2 * inv_n2
    v2 = jnp.maximum(q2 * inv_n2 - m2 * m2, 0.0)
    z = (conv - m2) * (jax.lax.rsqrt(v2 + EPS) * g2_ref[...]) + b2_ref[...]
    out_ref[...] = jnp.maximum(z, 0.0)


def branch4_forward(x, w1, w2, g1, b1, g2, b2, *, stride):
    """x: (N, Cin, L) f32 -> (N, Cout, L_out) f32, NCL in / NCL out (no transposes)."""
    N, Cin, L = x.shape
    Cout = w1.shape[0]
    L_out = (L + 2 * PAD - K) // stride + 1

    g1r, b1r = g1.reshape(1, Cout, 1), b1.reshape(1, Cout, 1)
    g2r, b2r = g2.reshape(1, Cout, 1), b2.reshape(1, Cout, 1)

    scratch_shapes = []
    if stride != 1:
        scratch_shapes.append(pltpu.VMEM((N, Cout, L), jnp.float32))

    kernel = functools.partial(_branch4_kernel, N=N, Cin=Cin, Cout=Cout,
                               L=L, L_out=L_out, stride=stride)

    # Explicit scoped-VMEM budget, safe on v7x (64 MiB physical / TC) as well
    # as v5e / v6e, with generous headroom over the actual footprint.
    slab_bytes = 4 * N * Cout * max(L, 1)
    vmem_limit = int(min(48 * 1024 * 1024, max(16 * 1024 * 1024, 16 * slab_bytes)))

    # TODO(synk): for N*L too large for VMEM this needs a tiled grid with a
    # two-pass (sum / sum-of-squares accumulation) BatchNorm across tiles.
    return pl.pallas_call(
        kernel,
        out_shape=jax.ShapeDtypeStruct((N, Cout, L_out), jnp.float32),
        in_specs=[pl.BlockSpec(memory_space=pltpu.MemorySpace.VMEM)] * 7,
        out_specs=pl.BlockSpec(memory_space=pltpu.MemorySpace.VMEM),
        scratch_shapes=scratch_shapes,
        compiler_params=pltpu.CompilerParams(vmem_limit_bytes=vmem_limit),
    )(x, w1, w2, g1r, b1r, g2r, b2r)


def branch4_reference(x, w1, w2, g1, b1, g2, b2, *, stride):
    """Pure-JAX reference matching PyTorch Branch_4.forward (training-mode BN)."""
    N, Cin, L = x.shape
    Cout = w1.shape[0]
    y = jnp.einsum('oc,ncl->nol', w1, x)
    m = y.mean((0, 2), keepdims=True)
    v = ((y - m) ** 2).mean((0, 2), keepdims=True)
    y = (y - m) / jnp.sqrt(v + EPS) * g1[None, :, None] + b1[None, :, None]
    y = jnp.maximum(y, 0.0)
    yp = jnp.pad(y, ((0, 0), (0, 0), (PAD, PAD)))
    L_out = (L + 2 * PAD - K) // stride + 1
    acc = jnp.zeros((N, Cout, L_out), jnp.float32)
    for k in range(K):
        acc = acc + yp[:, :, k:k + stride * (L_out - 1) + 1:stride] * w2[None, :, k:k + 1]
    m2 = acc.mean((0, 2), keepdims=True)
    v2 = ((acc - m2) ** 2).mean((0, 2), keepdims=True)
    z = (acc - m2) / jnp.sqrt(v2 + EPS) * g2[None, :, None] + b2[None, :, None]
    return jnp.maximum(z, 0.0)


if __name__ == "__main__":
    # Small shapes consistent with Conv1d input (N, C_in, L); L on lanes.
    N, Cin, Cout, L, stride = 2, 4, 8, 128, 1

    key = jax.random.PRNGKey(0)
    kx, k1, k2, k3, k4, k5, k6 = jax.random.split(key, 7)
    x = jax.random.normal(kx, (N, Cin, L), dtype=jnp.float32)

    # Deterministic synthetic parameters (shapes per nn.Module __init__).
    w1 = jax.random.normal(k1, (Cout, Cin), dtype=jnp.float32) * 0.3    # Conv1d k=1
    w2 = jax.random.normal(k2, (Cout, K), dtype=jnp.float32) * 0.3      # depthwise k=9 (squeezed)
    g1 = 1.0 + 0.1 * jax.random.normal(k3, (Cout,), dtype=jnp.float32)  # BN1 gamma
    b1 = 0.05 * jax.random.normal(k4, (Cout,), dtype=jnp.float32)       # BN1 beta
    g2 = 1.0 + 0.1 * jax.random.normal(k5, (Cout,), dtype=jnp.float32)  # BN2 gamma
    b2 = 0.05 * jax.random.normal(k6, (Cout,), dtype=jnp.float32)       # BN2 beta

    fwd = jax.jit(functools.partial(branch4_forward, stride=stride))
    out = fwd(x, w1, w2, g1, b1, g2, b2)
    out = jax.block_until_ready(out)

    ref = branch4_reference(x, w1, w2, g1, b1, g2, b2, stride=stride)
    L_out = (L + 2 * PAD - K) // stride + 1
    assert out.shape == ref.shape == (N, Cout, L_out)
    assert jnp.allclose(out, ref, atol=2e-4, rtol=2e-4), \
        f"max abs err {jnp.max(jnp.abs(out - ref))}"

    print("KERNEL_OK")
</pallas_src>

<mosaic_0001>
module attributes {stable_mosaic.version = 11 : i64} {
  func.func @_branch4_kernel(%arg0: memref<2x4x128xf32, #tpu.memory_space<vmem>>, %arg1: memref<8x4xf32, #tpu.memory_space<vmem>>, %arg2: memref<8x9xf32, #tpu.memory_space<vmem>>, %arg3: memref<1x8x1xf32, #tpu.memory_space<vmem>>, %arg4: memref<1x8x1xf32, #tpu.memory_space<vmem>>, %arg5: memref<1x8x1xf32, #tpu.memory_space<vmem>>, %arg6: memref<1x8x1xf32, #tpu.memory_space<vmem>>, %arg7: memref<2x8x128xf32, #tpu.memory_space<vmem>>) attributes {dimension_semantics = [], scalar_prefetch = 0 : i64, scratch_operands = 0 : i64, tpu.core_type = #tpu.core_type<tc>} {
    %c0 = arith.constant 0 : index
    %c0_0 = arith.constant 0 : index
    %c0_1 = arith.constant 0 : index
    %0 = vector.load %arg0[%c0, %c0_0, %c0_1] : memref<2x4x128xf32, #tpu.memory_space<vmem>>, vector<2x4x128xf32>
    %c0_2 = arith.constant 0 : index
    %c0_3 = arith.constant 0 : index
    %1 = vector.load %arg1[%c0_2, %c0_3] : memref<8x4xf32, #tpu.memory_space<vmem>>, vector<8x4xf32>
    %2 = vector.extract_strided_slice %0 {offsets = [0, 0, 0], sizes = [2, 1, 128], strides = [1, 1, 1]} : vector<2x4x128xf32> to vector<2x1x128xf32>
    %3 = vector.extract_strided_slice %1 {offsets = [0, 0], sizes = [8, 1], strides = [1, 1]} : vector<8x4xf32> to vector<8x1xf32>
    %4 = vector.shape_cast %3 : vector<8x1xf32> to vector<1x8x1xf32>
    %5 = vector.broadcast %2 : vector<2x1x128xf32> to vector<2x8x128xf32>
    %6 = vector.broadcast %4 : vector<1x8x1xf32> to vector<2x8x128xf32>
    %7 = arith.mulf %5, %6 : vector<2x8x128xf32>
    %8 = vector.extract_strided_slice %0 {offsets = [0, 1, 0], sizes = [2, 1, 128], strides = [1, 1, 1]} : vector<2x4x128xf32> to vector<2x1x128xf32>
    %9 = vector.extract_strided_slice %1 {offsets = [0, 1], sizes = [8, 1], strides = [1, 1]} : vector<8x4xf32> to vector<8x1xf32>
    %10 = vector.shape_cast %9 : vector<8x1xf32> to vector<1x8x1xf32>
    %11 = vector.broadcast %8 : vector<2x1x128xf32> to vector<2x8x128xf32>
    %12 = vector.broadcast %10 : vector<1x8x1xf32> to vector<2x8x128xf32>
    %13 = arith.mulf %11, %12 : vector<2x8x128xf32>
    %14 = arith.addf %7, %13 : vector<2x8x128xf32>
    %15 = vector.extract_strided_slice %0 {offsets = [0, 2, 0], sizes = [2, 1, 128], strides = [1, 1, 1]} : vector<2x4x128xf32> to vector<2x1x128xf32>
    %16 = vector.extract_strided_slice %1 {offsets = [0, 2], sizes = [8, 1], strides = [1, 1]} : vector<8x4xf32> to vector<8x1xf32>
    %17 = vector.shape_cast %16 : vector<8x1xf32> to vector<1x8x1xf32>
    %18 = vector.broadcast %15 : vector<2x1x128xf32> to vector<2x8x128xf32>
    %19 = vector.broadcast %17 : vector<1x8x1xf32> to vector<2x8x128xf32>
    %20 = arith.mulf %18, %19 : vector<2x8x128xf32>
    %21 = arith.addf %14, %20 : vector<2x8x128xf32>
    %22 = vector.extract_strided_slice %0 {offsets = [0, 3, 0], sizes = [2, 1, 128], strides = [1, 1, 1]} : vector<2x4x128xf32> to vector<2x1x128xf32>
    %23 = vector.extract_strided_slice %1 {offsets = [0, 3], sizes = [8, 1], strides = [1, 1]} : vector<8x4xf32> to vector<8x1xf32>
    %24 = vector.shape_cast %23 : vector<8x1xf32> to vector<1x8x1xf32>
    %25 = vector.broadcast %22 : vector<2x1x128xf32> to vector<2x8x128xf32>
    %26 = vector.broadcast %24 : vector<1x8x1xf32> to vector<2x8x128xf32>
    %27 = arith.mulf %25, %26 : vector<2x8x128xf32>
    %28 = arith.addf %21, %27 : vector<2x8x128xf32>
    %cst = arith.constant dense<0.000000e+00> : vector<8xf32>
    %29 = vector.multi_reduction <add>, %28, %cst [0, 2] : vector<2x8x128xf32> to vector<8xf32>
    %30 = vector.shape_cast %29 : vector<8xf32> to vector<1x8x1xf32>
    %31 = arith.mulf %28, %28 : vector<2x8x128xf32>
    %cst_4 = arith.constant dense<0.000000e+00> : vector<8xf32>
    %32 = vector.multi_reduction <add>, %31, %cst_4 [0, 2] : vector<2x8x128xf32> to vector<8xf32>
    %33 = vector.shape_cast %32 : vector<8xf32> to vector<1x8x1xf32>
    %cst_5 = arith.constant 3.906250e-03 : f32
    %34 = vector.broadcast %cst_5 : f32 to vector<1x8x1xf32>
    %35 = arith.mulf %30, %34 : vector<1x8x1xf32>
    %cst_6 = arith.constant 3.906250e-03 : f32
    %36 = vector.broadcast %cst_6 : f32 to vector<1x8x1xf32>
    %37 = arith.mulf %33, %36 : vector<1x8x1xf32>
    %38 = arith.mulf %35, %35 : vector<1x8x1xf32>
    %39 = arith.subf %37, %38 : vector<1x8x1xf32>
    %cst_7 = arith.constant 0.000000e+00 : f32
    %40 = vector.broadcast %cst_7 : f32 to vector<1x8x1xf32>
    %41 = arith.maximumf %39, %40 : vector<1x8x1xf32>
    %42 = vector.broadcast %35 : vector<1x8x1xf32> to vector<2x8x128xf32>
    %43 = arith.subf %28, %42 : vector<2x8x128xf32>
    %cst_8 = arith.constant 9.99999974E-6 : f32
    %44 = vector.broadcast %cst_8 : f32 to vector<1x8x1xf32>
    %45 = arith.addf %41, %44 : vector<1x8x1xf32>
    %46 = math.rsqrt %45 : vector<1x8x1xf32>
    %c0_9 = arith.constant 0 : index
    %c0_10 = arith.constant 0 : index
    %c0_11 = arith.constant 0 : index
    %47 = vector.load %arg3[%c0_9, %c0_10, %c0_11] : memref<1x8x1xf32, #tpu.memory_space<vmem>>, vector<1x8x1xf32>
    %48 = arith.mulf %46, %47 : vector<1x8x1xf32>
    %49 = vector.broadcast %48 : vector<1x8x1xf32> to vector<2x8x128xf32>
    %50 = arith.mulf %43, %49 : vector<2x8x128xf32>
    %c0_12 = arith.constant 0 : index
    %c0_13 = arith.constant 0 : index
    %c0_14 = arith.constant 0 : index
    %51 = vector.load %arg4[%c0_12, %c0_13, %c0_14] : memref<1x8x1xf32, #tpu.memory_space<vmem>>, vector<1x8x1xf32>
    %52 = vector.broadcast %51 : vector<1x8x1xf32> to vector<2x8x128xf32>
    %53 = arith.addf %50, %52 : vector<2x8x128xf32>
    %cst_15 = arith.constant 0.000000e+00 : f32
    %54 = vector.broadcast %cst_15 : f32 to vector<2x8x128xf32>
    %55 = arith.maximumf %53, %54 : vector<2x8x128xf32>
    %c0_16 = arith.constant 0 : index
    %c0_17 = arith.constant 0 : index
    %56 = vector.load %arg2[%c0_16, %c0_17] : memref<8x9xf32, #tpu.memory_space<vmem>>, vector<8x9xf32>
    %57 = vector.extract_strided_slice %56 {offsets = [0, 0], sizes = [8, 1], strides = [1, 1]} : vector<8x9xf32> to vector<8x1xf32>
    %58 = vector.shape_cast %57 : vector<8x1xf32> to vector<1x8x1xf32>
    %59 = vector.extract_strided_slice %56 {offsets = [0, 1], sizes = [8, 1], strides = [1, 1]} : vector<8x9xf32> to vector<8x1xf32>
    %60 = vector.shape_cast %59 : vector<8x1xf32> to vector<1x8x1xf32>
    %61 = vector.extract_strided_slice %56 {offsets = [0, 2], sizes = [8, 1], strides = [1, 1]} : vector<8x9xf32> to vector<8x1xf32>
    %62 = vector.shape_cast %61 : vector<8x1xf32> to vector<1x8x1xf32>
    %63 = vector.extract_strided_slice %56 {offsets = [0, 3], sizes = [8, 1], strides = [1, 1]} : vector<8x9xf32> to vector<8x1xf32>
    %64 = vector.shape_cast %63 : vector<8x1xf32> to vector<1x8x1xf32>
    %65 = vector.extract_strided_slice %56 {offsets = [0, 4], sizes = [8, 1], strides = [1, 1]} : vector<8x9xf32> to vector<8x1xf32>
    %66 = vector.shape_cast %65 : vector<8x1xf32> to vector<1x8x1xf32>
    %67 = vector.extract_strided_slice %56 {offsets = [0, 5], sizes = [8, 1], strides = [1, 1]} : vector<8x9xf32> to vector<8x1xf32>
    %68 = vector.shape_cast %67 : vector<8x1xf32> to vector<1x8x1xf32>
    %69 = vector.extract_strided_slice %56 {offsets = [0, 6], sizes = [8, 1], strides = [1, 1]} : vector<8x9xf32> to vector<8x1xf32>
    %70 = vector.shape_cast %69 : vector<8x1xf32> to vector<1x8x1xf32>
    %71 = vector.extract_strided_slice %56 {offsets = [0, 7], sizes = [8, 1], strides = [1, 1]} : vector<8x9xf32> to vector<8x1xf32>
    %72 = vector.shape_cast %71 : vector<8x1xf32> to vector<1x8x1xf32>
    %73 = vector.extract_strided_slice %56 {offsets = [0, 8], sizes = [8, 1], strides = [1, 1]} : vector<8x9xf32> to vector<8x1xf32>
    %74 = vector.shape_cast %73 : vector<8x1xf32> to vector<1x8x1xf32>
    %cst_18 = arith.constant 0.000000e+00 : f32
    %75 = vector.broadcast %cst_18 : f32 to vector<2x8x4xf32>
    %76 = vector.broadcast %66 : vector<1x8x1xf32> to vector<2x8x128xf32>
    %77 = arith.mulf %55, %76 : vector<2x8x128xf32>
    %cst_19 = arith.constant 0.000000e+00 : f32
    %78 = vector.broadcast %cst_19 : f32 to vector<2x8x128xf32>
    %79 = vector.extract_strided_slice %55 {offsets = [0, 0, 0], sizes = [2, 8, 124], strides = [1, 1, 1]} : vector<2x8x128xf32> to vector<2x8x124xf32>
    %80 = tpu.concatenate %75, %79 in 2 : vector<2x8x4xf32>, vector<2x8x124xf32> -> vector<2x8x128xf32>
    %81 = vector.broadcast %58 : vector<1x8x1xf32> to vector<2x8x128xf32>
    %82 = arith.mulf %80, %81 : vector<2x8x128xf32>
    %83 = arith.addf %77, %82 : vector<2x8x128xf32>
    %84 = vector.extract_strided_slice %75 {offsets = [0, 0, 0], sizes = [2, 8, 3], strides = [1, 1, 1]} : vector<2x8x4xf32> to vector<2x8x3xf32>
    %85 = vector.extract_strided_slice %55 {offsets = [0, 0, 0], sizes = [2, 8, 125], strides = [1, 1, 1]} : vector<2x8x128xf32> to vector<2x8x125xf32>
    %86 = tpu.concatenate %84, %85 in 2 : vector<2x8x3xf32>, vector<2x8x125xf32> -> vector<2x8x128xf32>
    %87 = vector.broadcast %60 : vector<1x8x1xf32> to vector<2x8x128xf32>
    %88 = arith.mulf %86, %87 : vector<2x8x128xf32>
    %89 = arith.addf %78, %88 : vector<2x8x128xf32>
    %90 = vector.extract_strided_slice %75 {offsets = [0, 0, 0], sizes = [2, 8, 2], strides = [1, 1, 1]} : vector<2x8x4xf32> to vector<2x8x2xf32>
    %91 = vector.extract_strided_slice %55 {offsets = [0, 0, 0], sizes = [2, 8, 126], strides = [1, 1, 1]} : vector<2x8x128xf32> to vector<2x8x126xf32>
    %92 = tpu.concatenate %90, %91 in 2 : vector<2x8x2xf32>, vector<2x8x126xf32> -> vector<2x8x128xf32>
    %93 = vector.broadcast %62 : vector<1x8x1xf32> to vector<2x8x128xf32>
    %94 = arith.mulf %92, %93 : vector<2x8x128xf32>
    %95 = arith.addf %83, %94 : vector<2x8x128xf32>
    %96 = vector.extract_strided_slice %75 {offsets = [0, 0, 0], sizes = [2, 8, 1], strides = [1, 1, 1]} : vector<2x8x4xf32> to vector<2x8x1xf32>
    %97 = vector.extract_strided_slice %55 {offsets = [0, 0, 0], sizes = [2, 8, 127], strides = [1, 1, 1]} : vector<2x8x128xf32> to vector<2x8x127xf32>
    %98 = tpu.concatenate %96, %97 in 2 : vector<2x8x1xf32>, vector<2x8x127xf32> -> vector<2x8x128xf32>
    %99 = vector.broadcast %64 : vector<1x8x1xf32> to vector<2x8x128xf32>
    %100 = arith.mulf %98, %99 : vector<2x8x128xf32>
    %101 = arith.addf %89, %100 : vector<2x8x128xf32>
    %102 = vector.extract_strided_slice %55 {offsets = [0, 0, 1], sizes = [2, 8, 127], strides = [1, 1, 1]} : vector<2x8x128xf32> to vector<2x8x127xf32>
    %103 = vector.extract_strided_slice %75 {offsets = [0, 0, 0], sizes = [2, 8, 1], strides = [1, 1, 1]} : vector<2x8x4xf32> to vector<2x8x1xf32>
    %104 = tpu.concatenate %102, %103 in 2 : vector<2x8x127xf32>, vector<2x8x1xf32> -> vector<2x8x128xf32>
    %105 = vector.broadcast %68 : vector<1x8x1xf32> to vector<2x8x128xf32>
    %106 = arith.mulf %104, %105 : vector<2x8x128xf32>
    %107 = arith.addf %101, %106 : vector<2x8x128xf32>
    %108 = vector.extract_strided_slice %55 {offsets = [0, 0, 2], sizes = [2, 8, 126], strides = [1, 1, 1]} : vector<2x8x128xf32> to vector<2x8x126xf32>
    %109 = vector.extract_strided_slice %75 {offsets = [0, 0, 0], sizes = [2, 8, 2], strides = [1, 1, 1]} : vector<2x8x4xf32> to vector<2x8x2xf32>
    %110 = tpu.concatenate %108, %109 in 2 : vector<2x8x126xf32>, vector<2x8x2xf32> -> vector<2x8x128xf32>
    %111 = vector.broadcast %70 : vector<1x8x1xf32> to vector<2x8x128xf32>
    %112 = arith.mulf %110, %111 : vector<2x8x128xf32>
    %113 = arith.addf %95, %112 : vector<2x8x128xf32>
    %114 = vector.extract_strided_slice %55 {offsets = [0, 0, 3], sizes = [2, 8, 125], strides = [1, 1, 1]} : vector<2x8x128xf32> to vector<2x8x125xf32>
    %115 = vector.extract_strided_slice %75 {offsets = [0, 0, 0], sizes = [2, 8, 3], strides = [1, 1, 1]} : vector<2x8x4xf32> to vector<2x8x3xf32>
    %116 = tpu.concatenate %114, %115 in 2 : vector<2x8x125xf32>, vector<2x8x3xf32> -> vector<2x8x128xf32>
    %117 = vector.broadcast %72 : vector<1x8x1xf32> to vector<2x8x128xf32>
    %118 = arith.mulf %116, %117 : vector<2x8x128xf32>
    %119 = arith.addf %107, %118 : vector<2x8x128xf32>
    %120 = vector.extract_strided_slice %55 {offsets = [0, 0, 4], sizes = [2, 8, 124], strides = [1, 1, 1]} : vector<2x8x128xf32> to vector<2x8x124xf32>
    %121 = tpu.concatenate %120, %75 in 2 : vector<2x8x124xf32>, vector<2x8x4xf32> -> vector<2x8x128xf32>
    %122 = vector.broadcast %74 : vector<1x8x1xf32> to vector<2x8x128xf32>
    %123 = arith.mulf %121, %122 : vector<2x8x128xf32>
    %124 = arith.addf %113, %123 : vector<2x8x128xf32>
    %125 = arith.addf %124, %119 : vector<2x8x128xf32>
    %cst_20 = arith.constant dense<0.000000e+00> : vector<8xf32>
    %126 = vector.multi_reduction <add>, %125, %cst_20 [0, 2] : vector<2x8x128xf32> to vector<8xf32>
    %127 = vector.shape_cast %126 : vector<8xf32> to vector<1x8x1xf32>
    %128 = arith.mulf %125, %125 : vector<2x8x128xf32>
    %cst_21 = arith.constant dense<0.000000e+00> : vector<8xf32>
    %129 = vector.multi_reduction <add>, %128, %cst_21 [0, 2] : vector<2x8x128xf32> to vector<8xf32>
    %130 = vector.shape_cast %129 : vector<8xf32> to vector<1x8x1xf32>
    %cst_22 = arith.constant 3.906250e-03 : f32
    %131 = vector.broadcast %cst_22 : f32 to vector<1x8x1xf32>
    %132 = arith.mulf %127, %131 : vector<1x8x1xf32>
    %cst_23 = arith.constant 3.906250e-03 : f32
    %133 = vector.broadcast %cst_23 : f32 to vector<1x8x1xf32>
    %134 = arith.mulf %130, %133 : vector<1x8x1xf32>
    %135 = arith.mulf %132, %132 : vector<1x8x1xf32>
    %136 = arith.subf %134, %135 : vector<1x8x1xf32>
    %cst_24 = arith.constant 0.000000e+00 : f32
    %137 = vector.broadcast %cst_24 : f32 to vector<1x8x1xf32>
    %138 = arith.maximumf %136, %137 : vector<1x8x1xf32>
    %139 = vector.broadcast %132 : vector<1x8x1xf32> to vector<2x8x128xf32>
    %140 = arith.subf %125, %139 : vector<2x8x128xf32>
    %cst_25 = arith.constant 9.99999974E-6 : f32
    %141 = vector.broadcast %cst_25 : f32 to vector<1x8x1xf32>
    %142 = arith.addf %138, %141 : vector<1x8x1xf32>
    %143 = math.rsqrt %142 : vector<1x8x1xf32>
    %c0_26 = arith.constant 0 : index
    %c0_27 = arith.constant 0 : index
    %c0_28 = arith.constant 0 : index
    %144 = vector.load %arg5[%c0_26, %c0_27, %c0_28] : memref<1x8x1xf32, #tpu.memory_space<vmem>>, vector<1x8x1xf32>
    %145 = arith.mulf %143, %144 : vector<1x8x1xf32>
    %146 = vector.broadcast %145 : vector<1x8x1xf32> to vector<2x8x128xf32>
    %147 = arith.mulf %140, %146 : vector<2x8x128xf32>
    %c0_29 = arith.constant 0 : index
    %c0_30 = arith.constant 0 : index
    %c0_31 = arith.constant 0 : index
    %148 = vector.load %arg6[%c0_29, %c0_30, %c0_31] : memref<1x8x1xf32, #tpu.memory_space<vmem>>, vector<1x8x1xf32>
    %149 = vector.broadcast %148 : vector<1x8x1xf32> to vector<2x8x128xf32>
    %150 = arith.addf %147, %149 : vector<2x8x128xf32>
    %cst_32 = arith.constant 0.000000e+00 : f32
    %151 = vector.broadcast %cst_32 : f32 to vector<2x8x128xf32>
    %152 = arith.maximumf %150, %151 : vector<2x8x128xf32>
    %c0_33 = arith.constant 0 : index
    %c0_34 = arith.constant 0 : index
    %c0_35 = arith.constant 0 : index
    %153 = vector.load %arg7[%c0_33, %c0_34, %c0_35] : memref<2x8x128xf32, #tpu.memory_space<vmem>>, vector<2x8x128xf32>
    tpu.vector_store %arg7[%c0_33, %c0_34, %c0_35], %152 {strides = array<i32>} : memref<2x8x128xf32, #tpu.memory_space<vmem>>, vector<2x8x128xf32>,
    return
  }
}

</mosaic_0001>

<bundles_post_ra>
// kernel: branch4_forward.1
= control target key start
LH: loop header
LB: loop body
LE: loop exit
PB: predicated region body
PF: predicated region fallthrough
CT: control target
= control target key end

     0   :  { %v396_v1 = vmov 0   ;;  %v397_v2 = vmov 2   ;;  %s508_s0 = inlined_call_operand.vmem [shape: f32[2,4,128], index: 0, kind: input, shape index: {}]   ;;  %s509_s1 = inlined_call_operand.vmem [shape: f32[8,4], index: 1, kind: input, shape index: {}]   ;;  %s510_s2 = inlined_call_operand.vmem [shape: f32[8,9], index: 2, kind: input, shape index: {}]   ;;  %s511_s3 = inlined_call_operand.vmem [shape: f32[1,8,1], index: 3, kind: input, shape index: {}]   ;;  %s512_s4 = inlined_call_operand.vmem [shape: f32[1,8,1], index: 4, kind: input, shape index: {}]   ;;  %s513_s5 = inlined_call_operand.vmem [shape: f32[1,8,1], index: 5, kind: input, shape index: {}]   ;;  %s514_s6 = inlined_call_operand.vmem [shape: f32[1,8,1], index: 6, kind: input, shape index: {}]   ;;  %s515_s7 = inlined_call_operand.hbm [shape: f32[2,8,128], index: 7, kind: output, shape index: {}]  }
   0x1   :  { %v29_v0 = vld [vmem:[%s509_s1] sm:$0xff]  ;;  %351 = vset.pattern.permute.xlu0 %v396_v1  ;;  %353 = vset.pattern.permute.xlu1 %v397_v2 }
   0x2   :  { %12 = vsyncpa [#allocation3], 0  ;;  %40 = vperm.xlu0 %351, %v29_v0   ;;  %70 = vperm.xlu1 %353, %v29_v0   ;;  %v398_v3 = vmov 1   ;;  %v399_v4 = vmov 3   ;;  %v30_v5 = vlaneseq  ;;  %v27_v9 = vld [vmem:[%s508_s0] sm:$0xf] }
   0x3   :  { %v28_v10 = vld [vmem:[%s508_s0 + $0x4] sm:$0xf]  ;;  %v400_v45 = vmov 4   ;;  %v401_v46 = vmov 5   ;;  %v402_v47 = vmov 6   ;;  %v403_v48 = vmov 8  }
   0x4   :  { %v31_v6 = vshrl.u32 %v30_v5, 7  ;;  %v119_v43 = vld [vmem:[%s512_s4] sm:$0xff]  ;;  %v404_v60 = vmov 7   ;;  %s405_s9 = smov 4   ;;  %s407_s10 = smov 2   ;;  %vm145_vm0 = vcmask 31744  }
   0x5   :  { %v129_v44 = vld [vmem:[%s510_s2] sm:$0xff]  ;;  %s408_s11 = smov 1   ;;  %s409_s12 = smov 127   ;;  %vm196_vm1 = vcmask 7168   ;;  %vm162_vm2 = vcmask 23552   ;;  %vm179_vm3 = vcmask 15360  }
   0x6   :  { %352 = vset.pattern.permute.xlu0 %v398_v3  ;;  %354 = vset.pattern.permute.xlu1 %v399_v4  ;;  %v32_v7 = vsub.s32 0, %v31_v6  ;;  %v47_v8 = vsub.s32 1, %v31_v6  ;;  %v63_v11 = vsub.s32 2, %v31_v6  ;;  %v79_v14 = vsub.s32 3, %v31_v6  ;;  %v110_v57 = vld [vmem:[%s511_s3] sm:$0xff]  ;;  %s406_s3 = smov 3  }
   0x7   :  { %54 = vperm.xlu0 %352, %v29_v0   ;;  %86 = vperm.xlu1 %354, %v29_v0   ;;  %s410_s13 = smov 126   ;;  %s411_s14 = smov 125   ;;  %vm213_vm4 = vcmask 1039360   ;;  %vm230_vm5 = vcmask 1031168   ;;  %vm247_vm6 = vcmask 1022976   ;;  %vm264_vm7 = vcmask 1014784  }
   0x8   :  { %v33_v15 = vrot.slane %v27_v9, %v32_v7  ;;  %v37_v16 = vrot.slane %v28_v10, %v32_v7  ;;  %v48_v17 = vrot.slane %v27_v9, %v47_v8  ;;  %v52_v18 = vrot.slane %v28_v10, %v47_v8  ;;  %s412_s15 = smov 124  }
   0x9   :  { %v64_v19 = vrot.slane %v27_v9, %v63_v11  ;;  %v68_v20 = vrot.slane %v28_v10, %v63_v11  ;;  %v80_v21 = vrot.slane %v27_v9, %v79_v14  ;;  %v84_v22 = vrot.slane %v28_v10, %v79_v14 }
   0xb   :  { %355 = vset.pattern.permute.xlu0 %v396_v1  ;;  %356 = vset.pattern.permute.xlu1 %v396_v1 }
  0x81   :  { %v41_v12 = vpop.permute.xlu0 %40  ;;  %v71_v13 = vpop.permute.xlu1 %70 }
  0x82   :  { %v43_v25 = vmul.f32 %v41_v12, %v33_v15  ;;  %v44_v26 = vmul.f32 %v41_v12, %v37_v16  ;;  %v73_v29 = vmul.f32 %v71_v13, %v64_v19  ;;  %v74_v30 = vmul.f32 %v71_v13, %v68_v20 }
  0x86   :  { %v55_v23 = vpop.permute.xlu0 %54  ;;  %v87_v24 = vpop.permute.xlu1 %86 }
  0x87   :  { %v57_v27 = vmul.f32 %v55_v23, %v48_v17  ;;  %v58_v28 = vmul.f32 %v55_v23, %v52_v18  ;;  %v89_v33 = vmul.f32 %v87_v24, %v80_v21  ;;  %v90_v34 = vmul.f32 %v87_v24, %v84_v22 }
  0x89   :  { %v59_v31 = vadd.f32 %v57_v27, %v43_v25  ;;  %v60_v32 = vadd.f32 %v58_v28, %v44_v26 }
  0x8b   :  { %v75_v35 = vadd.f32 %v73_v29, %v59_v31  ;;  %v76_v36 = vadd.f32 %v74_v30, %v60_v32 }
  0x8d   :  { %v91_v37 = vadd.f32 %v89_v33, %v75_v35  ;;  %v92_v38 = vadd.f32 %v90_v34, %v76_v36 }
  0x8f   :  { %v93_v39 = vadd.f32 %v92_v38, %v91_v37  ;;  %v96_v40 = vmul.f32 %v91_v37, %v91_v37  ;;  %v97_v41 = vmul.f32 %v92_v38, %v92_v38 }
  0x91   :  { %94 = vadd.xlane.f32.xlu1 %v93_v39  ;;  %v98_v42 = vadd.f32 %v97_v41, %v96_v40 }
  0x93   :  { %99 = vadd.xlane.f32.xlu0 %v98_v42 }
  0xa2   :  { %122 = vperm.xlu1 %356, %v119_v43  }
  0xa6   :  { %357 = vset.pattern.permute.xlu1 %v400_v45 }
  0xa7   :  { %132 = vperm.xlu1 %357, %v129_v44  }
  0xab   :  { %358 = vset.pattern.permute.xlu1 %v396_v1 }
  0xac   :  { %149 = vperm.xlu1 %358, %v129_v44  }
  0xb0   :  { %359 = vset.pattern.permute.xlu1 %v398_v3 }
  0xb1   :  { %166 = vperm.xlu1 %359, %v129_v44  }
  0xb5   :  { %360 = vset.pattern.permute.xlu1 %v397_v2 }
  0xb6   :  { %183 = vperm.xlu1 %360, %v129_v44  }
  0xba   :  { %361 = vset.pattern.permute.xlu1 %v399_v4 }
  0xbb   :  { %200 = vperm.xlu1 %361, %v129_v44  }
  0xbf   :  { %362 = vset.pattern.permute.xlu1 %v401_v46 }
  0xc0   :  { %217 = vperm.xlu1 %362, %v129_v44  }
  0xc4   :  { %363 = vset.pattern.permute.xlu1 %v402_v47 }
  0xc5   :  { %234 = vperm.xlu1 %363, %v129_v44  }
  0xc9   :  { %365 = vset.pattern.permute.xlu1 %v403_v48 }
  0xca   :  { %268 = vperm.xlu1 %365, %v129_v44  }
  0xce   :  { %367 = vset.pattern.permute.xlu1 %v396_v1 }
 0x11e   :  { %v95_v49 = vpop.xlane.xlu1 %94 }
 0x11f   :  { %v101_v50 = vmul.f32 0.00390625, %v95_v49 }
 0x120   :  { %v100_v51 = vpop.xlane.xlu0 %99 }
 0x121   :  { %v102_v52 = vmul.f32 0.00390625, %v100_v51  ;;  %v103_v53 = vmul.f32 %v101_v50, %v101_v50  ;;  %v106_v61 = vsub.f32 %v91_v37, %v101_v50  ;;  %v107_v62 = vsub.f32 %v92_v38, %v101_v50 }
 0x122   :  { %v123_v0 = vpop.permute.xlu1 %122 }
 0x123   :  { %v104_v54 = vsub.f32 %v102_v52, %v103_v53 }
 0x125   :  { %v105_v55 = vmax.f32 %v104_v54, 0.0 }
 0x127   :  { %v108_v56 = vadd.f32 1e-05, %v105_v55 }
 0x129   :  { %368 = vrsqrt.f32 %v108_v56 }
 0x133   :  { %v369_v58 = vpop.eup %368 }
 0x134   :  { %v111_v59 = vmul.f32 %v369_v58, %v110_v57 }
 0x136   :  { %114 = vperm.xlu0 %355, %v111_v59  }
 0x13a   :  { %364 = vset.pattern.permute.xlu0 %v404_v60 }
 0x13b   :  { %251 = vperm.xlu0 %364, %v129_v44  }
 0x13f   :  { %366 = vset.pattern.permute.xlu0 %v396_v1  ;;  %v133_v1 = vpop.permute.xlu1 %132 }
 0x143   :  { %v150_v8 = vpop.permute.xlu1 %149 }
 0x147   :  { %v167_v9 = vpop.permute.xlu1 %166 }
 0x14b   :  { %v184_v10 = vpop.permute.xlu1 %183 }
 0x14f   :  { %v201_v11 = vpop.permute.xlu1 %200 }
 0x153   :  { %v218_v12 = vpop.permute.xlu1 %217 }
 0x157   :  { %v235_v13 = vpop.permute.xlu1 %234 }
 0x15b   :  { %v480_v15 = vpop.permute.xlu1 %268 }
 0x1b5   :  { %v115_v63 = vpop.permute.xlu0 %114 }
 0x1b6   :  { %v117_v2 = vmul.f32 %v115_v63, %v106_v61  ;;  %v118_v3 = vmul.f32 %v115_v63, %v107_v62 }
 0x1b8   :  { %v125_v4 = vadd.f32 %v123_v0, %v117_v2  ;;  %v126_v5 = vadd.f32 %v123_v0, %v118_v3 }
 0x1ba   :  { %v127_v6 = vmax.f32 %v125_v4, 0.0  ;;  %v128_v7 = vmax.f32 %v126_v5, 0.0  ;;  %v252_v14 = vpop.permute.xlu0 %251 }
 0x1bc   :  { %141 = vrot.lane.b32.xlu1 %v128_v7, %s405_s9  ;;  %139 = vrot.lane.b32.xlu0 %v127_v6, %s405_s9  ;;  %v135_v26 = vmul.f32 %v133_v1, %v127_v6  ;;  %v136_v27 = vmul.f32 %v133_v1, %v128_v7 }
 0x1c0   :  { %156 = vrot.lane.b32.xlu1 %v127_v6, %s406_s3  ;;  %158 = vrot.lane.b32.xlu0 %v128_v7, %s406_s3 }
 0x1c4   :  { %173 = vrot.lane.b32.xlu1 %v127_v6, %s407_s10  ;;  %175 = vrot.lane.b32.xlu0 %v128_v7, %s407_s10 }
 0x1c8   :  { %190 = vrot.lane.b32.xlu1 %v127_v6, %s408_s11  ;;  %192 = vrot.lane.b32.xlu0 %v128_v7, %s408_s11 }
 0x1cc   :  { %207 = vrot.lane.b32.xlu1 %v127_v6, %s409_s12  ;;  %209 = vrot.lane.b32.xlu0 %v128_v7, %s409_s12 }
 0x1d0   :  { %224 = vrot.lane.b32.xlu1 %v127_v6, %s410_s13  ;;  %226 = vrot.lane.b32.xlu0 %v128_v7, %s410_s13 }
 0x1d4   :  { %241 = vrot.lane.b32.xlu1 %v127_v6, %s411_s14  ;;  %243 = vrot.lane.b32.xlu0 %v128_v7, %s411_s14 }
 0x1d8   :  { %258 = vrot.lane.b32.xlu1 %v127_v6, %s412_s15  ;;  %260 = vrot.lane.b32.xlu0 %v128_v7, %s412_s15 }
 0x22e   :  { %v140_v16 = vpop.permute.xlu0 %139  ;;  %v142_v17 = vpop.permute.xlu1 %141 }
 0x22f   :  { %v146_v28 = vsel %vm145_vm0, 0.0, %v140_v16  ;;  %v147_v29 = vsel %vm145_vm0, 0.0, %v142_v17 }
 0x230   :  { %v152_v38 = vmul.f32 %v150_v8, %v146_v28  ;;  %v153_v39 = vmul.f32 %v150_v8, %v147_v29 }
 0x232   :  { %v159_v18 = vpop.permute.xlu0 %158  ;;  %v157_v19 = vpop.permute.xlu1 %156  ;;  %v154_v56 = vadd.f32 %v152_v38, %v135_v26  ;;  %v155_v57 = vadd.f32 %v153_v39, %v136_v27 }
 0x233   :  { %v164_v34 = vsel %vm162_vm2, 0.0, %v159_v18  ;;  %v163_v35 = vsel %vm162_vm2, 0.0, %v157_v19 }
 0x234   :  { %v170_v46 = vmul.f32 %v167_v9, %v164_v34  ;;  %v169_v47 = vmul.f32 %v167_v9, %v163_v35 }
 0x236   :  { %v176_v20 = vpop.permute.xlu0 %175  ;;  %v174_v21 = vpop.permute.xlu1 %173 }
 0x237   :  { %v181_v36 = vsel %vm179_vm3, 0.0, %v176_v20  ;;  %v180_v37 = vsel %vm179_vm3, 0.0, %v174_v21 }
 0x238   :  { %v187_v48 = vmul.f32 %v184_v10, %v181_v36  ;;  %v186_v49 = vmul.f32 %v184_v10, %v180_v37 }
 0x23a   :  { %v193_v22 = vpop.permute.xlu0 %192  ;;  %v191_v23 = vpop.permute.xlu1 %190  ;;  %v189_v62 = vadd.f32 %v187_v48, %v155_v57  ;;  %v188_v63 = vadd.f32 %v186_v49, %v154_v56 }
 0x23b   :  { %v198_v30 = vsel %vm196_vm1, 0.0, %v193_v22  ;;  %v197_v31 = vsel %vm196_vm1, 0.0, %v191_v23  ;;  %v303_v23 = vld [vmem:[%s514_s6] sm:$0xff]  ;;  %s413_s6 = smov [#allocation2]  }
 0x23c   :  { %v204_v42 = vmul.f32 %v201_v11, %v198_v30  ;;  %v203_v43 = vmul.f32 %v201_v11, %v197_v31  ;;  %v294_v31 = vld [vmem:[%s513_s5] sm:$0xff]  ;;  %s320_s20 = sshll.u32 %s413_s6, 4  ;;  %s321_s20 = int_to_ptr.vmem [resolvable:$true] %s320_s20 }
 0x23d   :  { %s372_s21 = scalar_lea.vmem %s321_s20, 256  ;;  %p377_p1 = scmp.lt.s32.totalorder %s321_s20, %s321_s20 }
 0x23e   :  { %v210_v24 = vpop.permute.xlu0 %209  ;;  %v208_v25 = vpop.permute.xlu1 %207  ;;  %v206_v60 = vadd.f32 %v204_v42, %v170_v46  ;;  %v205_v61 = vadd.f32 %v203_v43, %v169_v47  ;;  %p373_p0 = scmp.ne.s32.totalorder %s321_s20, %s372_s21  ;;  %p378_p2 = scmp.lt.s32.totalorder %s372_s21, %s372_s21 }
 0x23f   :  { %v215_v40 = vsel %vm213_vm4, %v210_v24, 0.0  ;;  %v214_v41 = vsel %vm213_vm4, %v208_v25, 0.0 }
 0x240   :  { %v221_v52 = vmul.f32 %v218_v12, %v215_v40  ;;  %v220_v53 = vmul.f32 %v218_v12, %v214_v41  ;;  %p379_p3 = por %p378_p2, %p377_p1 }
 0x242   :  { %v227_v32 = vpop.permute.xlu0 %226  ;;  %v225_v33 = vpop.permute.xlu1 %224  ;;  %v223_v5 = vadd.f32 %v221_v52, %v206_v60  ;;  %v222_v6 = vadd.f32 %v220_v53, %v205_v61  ;;  %p380_p4 = pnand %p379_p3, %p373_p0 }
 0x243   :  { %v232_v44 = vsel %vm230_vm5, %v227_v32, 0.0  ;;  %v231_v45 = vsel %vm230_vm5, %v225_v33, 0.0 }
 0x244   :  { %v238_v58 = vmul.f32 %v235_v13, %v232_v44  ;;  %v237_v59 = vmul.f32 %v235_v13, %v231_v45 }
 0x246   :  { %v244_v50 = vpop.permute.xlu0 %243  ;;  %v242_v51 = vpop.permute.xlu1 %241  ;;  %v240_v8 = vadd.f32 %v238_v58, %v189_v62  ;;  %v239_v9 = vadd.f32 %v237_v59, %v188_v63 }
 0x247   :  { %v249_v54 = vsel %vm247_vm6, %v244_v50, 0.0  ;;  %v248_v55 = vsel %vm247_vm6, %v242_v51, 0.0 }
 0x248   :  { %v255_v0 = vmul.f32 %v252_v14, %v249_v54  ;;  %v254_v2 = vmul.f32 %v252_v14, %v248_v55 }
 0x24a   :  { %v261_v3 = vpop.permute.xlu0 %260  ;;  %v259_v4 = vpop.permute.xlu1 %258  ;;  %v257_v12 = vadd.f32 %v255_v0, %v223_v5  ;;  %v256_v13 = vadd.f32 %v254_v2, %v222_v6 }
 0x24b   :  { %v266_v7 = vsel %vm264_vm7, %v261_v3, 0.0  ;;  %v265_v1 = vsel %vm264_vm7, %v259_v4, 0.0 }
 0x24c   :  { %v272_v10 = vmul.f32 %v480_v15, %v266_v7  ;;  %v271_v11 = vmul.f32 %v480_v15, %v265_v1 }
 0x24e   :  { %v274_v16 = vadd.f32 %v272_v10, %v240_v8  ;;  %v273_v17 = vadd.f32 %v271_v11, %v239_v9 }
 0x250   :  { %v276_v18 = vadd.f32 %v274_v16, %v257_v12  ;;  %v275_v14 = vadd.f32 %v273_v17, %v256_v13 }
 0x252   :  { %v277_v19 = vadd.f32 %v276_v18, %v275_v14  ;;  %v280_v20 = vmul.f32 %v275_v14, %v275_v14  ;;  %v281_v21 = vmul.f32 %v276_v18, %v276_v18 }
 0x254   :  { %278 = vadd.xlane.f32.xlu1 %v277_v19  ;;  %v282_v22 = vadd.f32 %v281_v21, %v280_v20 }
 0x256   :  { %283 = vadd.xlane.f32.xlu0 %v282_v22 }
 0x265   :  { %306 = vperm.xlu1 %367, %v303_v23  }
 0x2e1   :  { %v279_v24 = vpop.xlane.xlu1 %278 }
 0x2e2   :  { %v285_v25 = vmul.f32 0.00390625, %v279_v24 }
 0x2e3   :  { %v284_v15 = vpop.xlane.xlu0 %283 }
 0x2e4   :  { %v286_v26 = vmul.f32 0.00390625, %v284_v15  ;;  %v287_v27 = vmul.f32 %v285_v25, %v285_v25  ;;  %v290_v34 = vsub.f32 %v275_v14, %v285_v25  ;;  %v291_v35 = vsub.f32 %v276_v18, %v285_v25 }
 0x2e5   :  { %v307_v37 = vpop.permute.xlu1 %306 }
 0x2e6   :  { %v288_v28 = vsub.f32 %v286_v26, %v287_v27 }
 0x2e8   :  { %v289_v29 = vmax.f32 %v288_v28, 0.0 }
 0x2ea   :  { %v292_v30 = vadd.f32 1e-05, %v289_v29 }
 0x2ec   :  { %370 = vrsqrt.f32 %v292_v30 }
 0x2f6   :  { %v371_v32 = vpop.eup %370 }
 0x2f7   :  { %v295_v33 = vmul.f32 %v371_v32, %v294_v31 }
 0x2f9   :  { %298 = vperm.xlu0 %366, %v295_v33  }
 0x378   :  { %v299_v36 = vpop.permute.xlu0 %298 }
 0x379   :  { %v301_v38 = vmul.f32 %v299_v36, %v290_v34  ;;  %v302_v39 = vmul.f32 %v299_v36, %v291_v35 }
 0x37b   :  { %v309_v40 = vadd.f32 %v307_v37, %v301_v38  ;;  %v310_v41 = vadd.f32 %v307_v37, %v302_v39 }
 0x37d   :  { %v311_v42 = vmax.f32 %v309_v40, 0.0  ;;  %v312_v43 = vmax.f32 %v310_v41, 0.0 }
 0x37f   :  { %313 = vst [vmem:[#allocation2] sm:$0xff] %v311_v42  ;;  %314 = vst [vmem:[#allocation2 + $0x8] sm:$0xff] %v312_v43 }
 0x380   :  { %383 = shalt.err (!%p380_p4)
}
 0x381   :  { %s384_s23 = scalar_lea.hbm %s515_s7, 256 }
 0x382   :  { %p385_p5 = scmp.ne.s32.totalorder %s515_s7, %s384_s23  ;;  %p388_p6 = scmp.lt.u32.totalorder %s384_s23, %s515_s7 }
 0x384   :  { %p390_p7 = pnand %p388_p6, %p385_p5 }
 0x386   :  { %393 = shalt.err (!%p390_p7)
}
 0x387   :  { %s414_s27 = smov 128   ;;  %s415_s28 = smov 8  }
 0x388   :  { %326 = dma.vmem_to_hbm [thread:$0]  %s321_s20, 256, %s515_s7, [#allocation3], %s414_s27, %s414_s27, %s415_s28  }
 0x389   :  { %394 = dma.done.wait [#allocation3], 256  }
 0x38a   :  { %395 = vsyncadd [#allocation3], 4294967040 }
 0x38b   :  { %330 = vsyncpa [#allocation3], 1 }

</bundles_post_ra>
